<compile_context>
chip_gen: v6e
topology: v6e:2x2x1
jax: 0.10.0
libtpu: 0.0.40
codegen_flags: <defaults>
</compile_context>

<pallas_src>
import functools

import jax
import jax.numpy as jnp
from jax.experimental import pallas as pl
from jax.experimental.pallas import tpu as pltpu

# Make the XLA reference matmul full-f32 so the comparison baseline is exact.
jax.config.update("jax_default_matmul_precision", "highest")

_SUBLANE = 8  # f32 sublane count


def _round_up(x, m):
    return ((x + m - 1) // m) * m


def _par_forward_kernel(*refs, use_exp_fun, clamp, has_bias):
    """y = x @ W (+ b); optional exp inverse link; optional clamp to [0, clamp]."""
    if has_bias:
        x_ref, w_ref, b_ref, o_ref = refs
    else:
        x_ref, w_ref, o_ref = refs
    # MXU matmul with f32 accumulation (inputs may be f32 or bf16).
    y = jnp.dot(x_ref[...], w_ref[...], preferred_element_type=jnp.float32)
    if has_bias:                      # static branch: no bias -> no add, no operand
        y = y + b_ref[...]            # VPU, (1, N) broadcast
    if use_exp_fun:                   # inverse link (fun=torch.exp)
        y = jnp.exp(y)                # EUP slot
    if clamp is not None:             # torch.clamp(x, min=0, max=clamp)
        y = jnp.clip(y, 0.0, clamp)   # VPU slot
    o_ref[...] = y.astype(o_ref.dtype)


def prepare_par_params(weight, bias=None, compute_dtype=None):
    """One-time (hoisted) parameter prep.

    Args:
      weight: [N, F] float32, PyTorch nn.Linear layout (out, in).
      bias:   [N] float32 or None (use_bias=False).
      compute_dtype: optional narrow dtype (e.g. jnp.bfloat16) for the matmul
        inputs; accumulation/bias/exp/clip/output stay f32.
    Returns:
      (w_t [F, N], b2d [1, N] or None) ready to feed par_forward repeatedly.
    """
    w_t = jnp.transpose(weight)
    if compute_dtype is not None:
        w_t = w_t.astype(compute_dtype)
    b2d = None if bias is None else bias.reshape(1, -1).astype(jnp.float32)
    return w_t, b2d


def par_forward(x, w_t, b2d=None, *, use_exp_fun=False, clamp=None, block_b=4096):
    """Pallas forward pass for PAR_torch_regressor.

    Args:
      x:    [B, F] float32 input features (F = N * p or N * L, flattened lags).
      w_t:  [F, N] prepared weight (prepare_par_params).
      b2d:  [1, N] prepared bias or None.
      use_exp_fun: emulate `fun=torch.exp` (module default fun=None -> False).
      clamp: optional float, emulates torch.clamp(x, min=0, max=clamp).
      block_b: batch tile size for the large-batch path (rows per grid step).
    Returns:
      [B, N] float32.
    """
    B, F = x.shape
    Fw, N = w_t.shape
    assert F == Fw, (F, Fw)
    out_dtype = jnp.float32
    if x.dtype != w_t.dtype:          # optional bf16 input path
        x = x.astype(w_t.dtype)

    has_bias = b2d is not None
    kernel = functools.partial(_par_forward_kernel,
                               use_exp_fun=use_exp_fun, clamp=clamp,
                               has_bias=has_bias)
    operands = [x, w_t] + ([b2d] if has_bias else [])

    if B <= block_b:
        # Small/medium batch: grid-less, whole operands resident in VMEM --
        # no per-step loop / pipeline bookkeeping, narrow (B, N) output.
        vmem = pl.BlockSpec(memory_space=pltpu.MemorySpace.VMEM)
        return pl.pallas_call(
            kernel,
            out_shape=jax.ShapeDtypeStruct((B, N), out_dtype),
            in_specs=[vmem] * len(operands),
            out_specs=vmem,
        )(*operands)

    # Large batch: cdiv grid over B (ragged last block handled by Pallas),
    # weight / bias stay resident (index_map -> (0, 0)), narrow (tm, N) output
    # blocks.  B > block_b guarantees >= 2 grid steps, so the "parallel" axis
    # lets v7x's two TensorCores split the grid; per-step footprint at the
    # default block_b is ~9 MiB, under v5e's 16 MiB scoped-VMEM default --
    # set vmem_limit_bytes here if you grow block_b past ~8-16K rows.
    tm = _round_up(min(block_b, B), _SUBLANE)
    grid = (pl.cdiv(B, tm),)

    in_specs = [
        pl.BlockSpec((tm, F), lambda i: (i, 0)),      # x tile, streamed over B
        pl.BlockSpec((F, N), lambda i: (0, 0)),       # weight, resident (full dims)
    ]
    if has_bias:
        in_specs.append(pl.BlockSpec((1, N), lambda i: (0, 0)))  # bias, resident

    return pl.pallas_call(
        kernel,
        out_shape=jax.ShapeDtypeStruct((B, N), out_dtype),
        grid=grid,
        in_specs=in_specs,
        out_specs=pl.BlockSpec((tm, N), lambda i: (i, 0)),
        compiler_params=pltpu.CompilerParams(
            dimension_semantics=("parallel",)),
    )(*operands)


def par_forward_ref(x, weight, bias=None, *, use_exp_fun=False, clamp=None):
    """Plain-JAX reference mirroring the PyTorch forward."""
    y = x @ weight.T
    if bias is not None:
        y = y + bias
    if use_exp_fun:
        y = jnp.exp(y)
    if clamp is not None:
        y = jnp.clip(y, 0.0, clamp)
    return y


if __name__ == "__main__":
    # Module hyperparameters (D=None -> mat_size = p, in_features = N * p).
    N, p = 4, 8
    F = N * p

    key = jax.random.PRNGKey(0)
    kx, kw, kb, kx2 = jax.random.split(key, 4)

    # Deterministic synthetic nn.Linear(N*p, N) parameters.
    bound = 1.0 / (F ** 0.5)
    weight = jax.random.uniform(kw, (N, F), minval=-bound, maxval=bound,
                                dtype=jnp.float32)
    bias = jax.random.uniform(kb, (N,), minval=-bound, maxval=bound,
                              dtype=jnp.float32)

    # Hoisted one-time parameter prep (perf feedback: not per call).
    w_t, b2d = prepare_par_params(weight, bias)
    w_t_nobias, _ = prepare_par_params(weight, None)

    # Loose tolerance: the MXU f32 matmul path may decompose f32 into bf16
    # passes, which can differ from the XLA reference by up to ~1e-2 after exp.
    ATOL = RTOL = 2e-2

    # ---- Small batch: grid-less VMEM-resident path --------------------------
    B_small = 8
    x_small = jax.random.normal(kx, (B_small, F), dtype=jnp.float32)

    out = jax.block_until_ready(par_forward(x_small, w_t, b2d))
    ref = par_forward_ref(x_small, weight, bias)
    assert out.shape == (B_small, N)
    assert jnp.allclose(out, ref, atol=ATOL, rtol=RTOL)

    # fun=exp + clamp path.
    out2 = jax.block_until_ready(
        par_forward(x_small, w_t, b2d, use_exp_fun=True, clamp=5.0))
    ref2 = par_forward_ref(x_small, weight, bias, use_exp_fun=True, clamp=5.0)
    assert jnp.allclose(out2, ref2, atol=ATOL, rtol=RTOL)

    # use_bias=False path (no bias operand at all).
    out3 = jax.block_until_ready(
        par_forward(x_small, w_t_nobias, None, use_exp_fun=True, clamp=5.0))
    ref3 = par_forward_ref(x_small, weight, None, use_exp_fun=True, clamp=5.0)
    assert jnp.allclose(out3, ref3, atol=ATOL, rtol=RTOL)

    # ---- Larger batch: cdiv grid, ragged last block, narrow output ----------
    B_big = 10000                      # > block_b and not a tile multiple
    x_big = jax.random.normal(kx2, (B_big, F), dtype=jnp.float32)

    out4 = jax.block_until_ready(
        par_forward(x_big, w_t, b2d, use_exp_fun=True, clamp=5.0, block_b=4096))
    ref4 = par_forward_ref(x_big, weight, bias, use_exp_fun=True, clamp=5.0)
    assert out4.shape == (B_big, N)
    assert jnp.allclose(out4, ref4, atol=ATOL, rtol=RTOL)

    print("KERNEL_OK")
</pallas_src>

<mosaic_0001>
module attributes {stable_mosaic.version = 11 : i64} {
  func.func @_par_forward_kernel(%arg0: memref<8x32xf32, #tpu.memory_space<vmem>>, %arg1: memref<32x4xf32, #tpu.memory_space<vmem>>, %arg2: memref<1x4xf32, #tpu.memory_space<vmem>>, %arg3: memref<8x4xf32, #tpu.memory_space<vmem>>) attributes {dimension_semantics = [], scalar_prefetch = 0 : i64, scratch_operands = 0 : i64, tpu.core_type = #tpu.core_type<tc>} {
    %c0 = arith.constant 0 : index
    %c0_0 = arith.constant 0 : index
    %0 = vector.load %arg0[%c0, %c0_0] : memref<8x32xf32, #tpu.memory_space<vmem>>, vector<8x32xf32>
    %c0_1 = arith.constant 0 : index
    %c0_2 = arith.constant 0 : index
    %1 = vector.load %arg1[%c0_1, %c0_2] : memref<32x4xf32, #tpu.memory_space<vmem>>, vector<32x4xf32>
    %cst = arith.constant dense<0.000000e+00> : vector<8x4xf32>
    %2 = tpu.matmul %0, %1, %cst {dimension_numbers = #tpu.dot_dimension_numbers<[1], [0], [0], [1], [0, 0, 1, 1], [], []>, precision = #tpu.contract_precision<fp32>} : vector<8x32xf32>, vector<32x4xf32>, vector<8x4xf32> -> vector<8x4xf32>
    %c0_3 = arith.constant 0 : index
    %c0_4 = arith.constant 0 : index
    %3 = vector.load %arg2[%c0_3, %c0_4] : memref<1x4xf32, #tpu.memory_space<vmem>>, vector<1x4xf32>
    %4 = vector.broadcast %3 : vector<1x4xf32> to vector<8x4xf32>
    %5 = arith.addf %2, %4 : vector<8x4xf32>
    %c0_5 = arith.constant 0 : index
    %c0_6 = arith.constant 0 : index
    %6 = vector.load %arg3[%c0_5, %c0_6] : memref<8x4xf32, #tpu.memory_space<vmem>>, vector<8x4xf32>
    tpu.vector_store %arg3[%c0_5, %c0_6], %5 {strides = array<i32>} : memref<8x4xf32, #tpu.memory_space<vmem>>, vector<8x4xf32>,
    return
  }
}

</mosaic_0001>

<bundles_post_ra>
// kernel: tpu_custom_call.1
= control target key start
LH: loop header
LB: loop body
LE: loop exit
PB: predicated region body
PF: predicated region fallthrough
CT: control target
= control target key end

     0   :  { %vm26_vm0 = vcmask 261120   ;;  %v620_v0 = vmov 0.0   ;;  %vm621_vm1 = vmmov 0   ;;  %vm515_vm2 = vcmask 31744   ;;  %s730_s1 = inlined_call_operand.vmem [shape: f32[32,4], index: 1, kind: input, shape index: {}]   ;;  %s731_s0 = inlined_call_operand.vmem [shape: f32[8,32], index: 0, kind: input, shape index: {}]   ;;  %s732_s2 = inlined_call_operand.vmem [shape: f32[1,4], index: 2, kind: input, shape index: {}]   ;;  %s733_s3 = inlined_call_operand.vmem [shape: f32[8,4], index: 3, kind: output, shape index: {}]  }
   0x1   :  { %552 = vmatprep.subr.mxu0 %v620_v0  ;;  %v18_v1 = vld [vmem:[%s730_s1 + $0x18] sm:$0xff]  ;;  %v17_v2 = vld [vmem:[%s730_s1 + $0x10] sm:$0xff]  ;;  %v16_v3 = vld [vmem:[%s730_s1 + $0x8] sm:$0xff]  ;;  %563 = vmatprep.subr.mxu1 %v620_v0 }
   0x2   :  { %v653_v4 = vand.u32 4294901760, %v18_v1  ;;  %v655_v5 = vand.u32 4294901760, %v17_v2  ;;  %v657_v6 = vand.u32 4294901760, %v16_v3  ;;  %v15_v7 = vld [vmem:[%s730_s1] sm:$0xff]  ;;  %560 = vmatprep.mubr.msk.f32.mxu0 %vm621_vm1, %v620_v0  ;;  %571 = vmatprep.mubr.msk.f32.mxu1 %vm621_vm1, %v620_v0 }
   0x3   :  { %v14_v8 = vld [vmem:[%s731_s0] sm:$0xff]  ;;  %v669_v9 = vand.u32 4294901760, %v15_v7 }
   0x4   :  { %v28_v10 = vsel %vm26_vm0, %v14_v8, 0  ;;  %553 = vmatpush3.msra.mxu0 %v653_v4  ;;  %v135_v11 = vsub.f32 %v18_v1, %v653_v4  ;;  %v142_v13 = vsub.f32 %v17_v2, %v655_v5  ;;  %v149_v14 = vsub.f32 %v16_v3, %v657_v6  ;;  %v521_v35 = vld [vmem:[%s732_s2] ss:$0 sm:$0xff] }
   0x5   :  { %v674_v12 = vand.u32 4294901760, %v28_v10  ;;  %554 = vmatprep.subr.mxu0 %v620_v0  ;;  %v156_v15 = vsub.f32 %v15_v7, %v669_v9 }
   0x6   :  { %555 = vmatpush3.msra.mxu0 %v655_v5  ;;  %v136_v16 = vand.u32 4294901760, %v135_v11  ;;  %v143_v18 = vand.u32 4294901760, %v142_v13  ;;  %v150_v19 = vand.u32 4294901760, %v149_v14 }
   0x7   :  { %v100_v17 = vsub.f32 %v28_v10, %v674_v12  ;;  %556 = vmatprep.subr.mxu0 %v620_v0  ;;  %v157_v20 = vand.u32 4294901760, %v156_v15 }
   0x8   :  { %557 = vmatpush3.msra.mxu0 %v657_v6  ;;  %v137_v21 = vsub.f32 %v135_v11, %v136_v16  ;;  %v144_v23 = vsub.f32 %v142_v13, %v143_v18  ;;  %v151_v24 = vsub.f32 %v149_v14, %v150_v19 }
   0x9   :  { %v101_v22 = vand.u32 4294901760, %v100_v17  ;;  %558 = vmatprep.subr.mxu0 %v620_v0  ;;  %v158_v28 = vsub.f32 %v156_v15, %v157_v20 }
   0xa   :  { %559 = vmatpush3.msra.mxu0 %v669_v9  ;;  %v138_v25 = vand.u32 4294901760, %v137_v21  ;;  %v145_v27 = vand.u32 4294901760, %v144_v23  ;;  %v152_v30 = vand.u32 4294901760, %v151_v24 }
   0xb   :  { %v102_v26 = vsub.f32 %v100_v17, %v101_v22  ;;  %574 = vmatprep.subr.mxu0 %v620_v0  ;;  %v159_v31 = vand.u32 4294901760, %v158_v28 }
   0xc   :  { %564 = vmatpush3.msra.mxu1 %v138_v25 }
   0xd   :  { %v103_v29 = vand.u32 4294901760, %v102_v26  ;;  %565 = vmatprep.subr.mxu1 %v620_v0 }
   0xe   :  { %566 = vmatpush3.msra.mxu1 %v145_v27 }
   0xf   :  { %561 = vmatmul.mubr.f32.vlgmr.msra.gmra.mxu0 %v103_v29  ;;  %567 = vmatprep.subr.mxu1 %v620_v0 }
  0x10   :  { %575 = vmatpush3.msra.mxu0 %v135_v11  ;;  %568 = vmatpush3.msra.mxu1 %v152_v30 }
  0x11   :  { %576 = vmatprep.subr.mxu0 %v620_v0  ;;  %569 = vmatprep.subr.mxu1 %v620_v0 }
  0x12   :  { %577 = vmatpush3.msra.mxu0 %v142_v13  ;;  %570 = vmatpush3.msra.mxu1 %v159_v31 }
  0x13   :  { %578 = vmatprep.subr.mxu0 %v620_v0  ;;  %572 = vmatmul.mubr.f32.vlgmr.msra.gmra.mxu1 %v674_v12 }
  0x14   :  { %579 = vmatpush3.msra.mxu0 %v149_v14  ;;  %585 = vmatprep.subr.mxu1 %v620_v0 }
  0x15   :  { %580 = vmatprep.subr.mxu0 %v620_v0  ;;  %586 = vmatpush3.msra.mxu1 %v653_v4 }
  0x16   :  { %581 = vmatpush3.msra.mxu0 %v156_v15  ;;  %582 = vmatprep.mubr.msk.f32.mxu0 %vm621_vm1, %v620_v0 }
  0x17   :  { %587 = vmatprep.subr.mxu1 %v620_v0  ;;  %596 = vmatprep.subr.mxu0 %v620_v0 }
  0x18   :  { %583 = vmatmul.mubr.f32.vlgmr.msra.gmra.mxu0 %v100_v17  ;;  %588 = vmatpush3.msra.mxu1 %v655_v5 }
  0x19   :  { %597 = vmatpush3.msra.mxu0 %v136_v16  ;;  %589 = vmatprep.subr.mxu1 %v620_v0 }
  0x1a   :  { %598 = vmatprep.subr.mxu0 %v620_v0  ;;  %590 = vmatpush3.msra.mxu1 %v657_v6 }
  0x1b   :  { %599 = vmatpush3.msra.mxu0 %v143_v18  ;;  %591 = vmatprep.subr.mxu1 %v620_v0 }
  0x1c   :  { %600 = vmatprep.subr.mxu0 %v620_v0  ;;  %592 = vmatpush3.msra.mxu1 %v669_v9 }
  0x1d   :  { %593 = vmatprep.mubr.msk.f32.mxu1 %vm621_vm1, %v620_v0  ;;  %601 = vmatpush3.msra.mxu0 %v150_v19 }
  0x1e   :  { %594 = vmatmul.mubr.f32.vlgmr.msra.gmra.mxu1 %v101_v22  ;;  %602 = vmatprep.subr.mxu0 %v620_v0 }
  0x1f   :  { %607 = vmatprep.subr.mxu1 %v620_v0  ;;  %603 = vmatpush3.msra.mxu0 %v157_v20 }
  0x20   :  { %604 = vmatprep.mubr.msk.f32.mxu0 %vm621_vm1, %v620_v0  ;;  %608 = vmatpush3.msra.mxu1 %v653_v4 }
  0x21   :  { %605 = vmatmul.mubr.f32.vlgmr.msra.gmra.mxu0 %v674_v12  ;;  %609 = vmatprep.subr.mxu1 %v620_v0 }
  0x22   :  { %615 = vmatprep.mubr.msk.f32.mxu1 %vm621_vm1, %v620_v0  ;;  %610 = vmatpush3.msra.mxu1 %v655_v5 }
  0x23   :  { %611 = vmatprep.subr.mxu1 %v620_v0 }
  0x24   :  { %612 = vmatpush3.msra.mxu1 %v657_v6 }
  0x25   :  { %613 = vmatprep.subr.mxu1 %v620_v0 }
  0x26   :  { %614 = vmatpush3.msra.mxu1 %v669_v9 }
  0x27   :  { %616 = vmatmul.mubr.f32.vlgmr.msra.gmra.mxu1 %v674_v12 }
  0xcf   :  { %v105_v32 = vpop.f32.mrf.mxu0 }
  0xd0   :  { %v106_v38 = vadd.f32 %v521_v35, %v105_v32 }
  0xd1   :  { %v562_v33 = vpop.f32.mrf.mxu0 }
  0xd3   :  { %v196_v34 = vpop.f32.mrf.mxu1 }
  0xd4   :  { %v197_v40 = vadd.f32 %v196_v34, %v106_v38 }
  0xd5   :  { %v573_v36 = vpop.f32.mrf.mxu1 }
  0xd8   :  { %v276_v37 = vpop.f32.mrf.mxu0 }
  0xd9   :  { %v277_v43 = vadd.f32 %v276_v37, %v197_v40 }
  0xda   :  { %v584_v39 = vpop.f32.mrf.mxu0 }
  0xde   :  { %v353_v41 = vpop.f32.mrf.mxu1 }
  0xdf   :  { %v354_v45 = vadd.f32 %v353_v41, %v277_v43 }
  0xe0   :  { %v595_v42 = vpop.f32.mrf.mxu1 }
  0xe1   :  { %v436_v44 = vpop.f32.mrf.mxu0 }
  0xe2   :  { %v437_v47 = vadd.f32 %v436_v44, %v354_v45 }
  0xe3   :  { %v606_v46 = vpop.f32.mrf.mxu0 }
  0xe7   :  { %v511_v48 = vpop.f32.mrf.mxu1 }
  0xe8   :  { %v512_v49 = vadd.f32 %v511_v48, %v437_v47 }
  0xe9   :  { %v617_v50 = vpop.f32.mrf.mxu1 }
  0xea   :  { %516 = vst.msk [vmem:[%s733_s3] sm:$0xff] %vm515_vm2, %v512_v49 }

</bundles_post_ra>
